<compile_context>
chip_gen: v7x
topology: tpu7x:2x2x1
jax: 0.10.0
libtpu: 0.0.40
codegen_flags: <defaults>
</compile_context>

<pallas_src>
import jax
import jax.numpy as jnp
from jax.experimental import pallas as pl
from jax.experimental.pallas import tpu as pltpu

_LANE = 128
_SUBLANE = 8


def _mlp_kernel(t_ref, x_ref, w1_ref, b1_ref, w2_ref, b2_ref, o_ref):
    # t_ref:  (N,) int32 in SMEM (scalar prefetch; consumed by the index_maps, unused here)
    # x_ref:  (B, D_in); w1_ref: (D_in, H_p); b1_ref: (1, H_p)
    # w2_ref: (H_p, D_out_p); b2_ref: (1, D_out_p); o_ref: (B, D_out_p)
    del t_ref
    x = x_ref[...]
    h = jnp.dot(x, w1_ref[...], preferred_element_type=jnp.float32) + b1_ref[...]
    h = jnp.maximum(h, 0.0)  # ReLU on the VPU
    h = h.astype(w2_ref.dtype)
    o = jnp.dot(h, w2_ref[...], preferred_element_type=jnp.float32) + b2_ref[...]
    o_ref[...] = o.astype(o_ref.dtype)


def _round_up(n, m):
    return ((n + m - 1) // m) * m


def _pad_lane_dense(w1, b1, w2, b2, lane=_LANE):
    """Zero-pad the hidden dim (H) and output dim (D_out) to full 128-lane tiles.

    Exact: padded hidden units have zero in-weights and zero bias -> ReLU gives 0,
    and their zero rows in w2 contribute nothing; padded output columns are sliced
    off in the wrapper.
    """
    h = w1.shape[-1]
    h_pad = max(lane, _round_up(h, lane))
    if h_pad != h:
        w1 = jnp.pad(w1, ((0, 0), (0, 0), (0, h_pad - h)))
        b1 = jnp.pad(b1, ((0, 0), (0, 0), (0, h_pad - h)))
        w2 = jnp.pad(w2, ((0, 0), (0, h_pad - h), (0, 0)))
    d = w2.shape[-1]
    d_pad = max(lane, _round_up(d, lane))
    if d_pad != d:
        w2 = jnp.pad(w2, ((0, 0), (0, 0), (0, d_pad - d)))
        b2 = jnp.pad(b2, ((0, 0), (0, 0), (0, d_pad - d)))
    return w1, b1, w2, b2


def mlp_forward_batched(t_indices, xs, w1, b1, w2, b2, *, d_out=None):
    """Run N dispatches model[t_indices[i]](xs[i]) in a single Pallas kernel.

    xs: (N, B, D_in); t_indices: (N,) int32.
    Weights are stacked along a leading T axis; H and D_out are lane-padded.
    Returns (N, B, d_out).
    """
    N, B, D_in = xs.shape
    T, _, H_p = w1.shape
    D_out_p = w2.shape[-1]
    if d_out is None:
        d_out = D_out_p

    # Sublane-align the row (M) dimension.
    B_pad = _round_up(B, _SUBLANE)
    if B_pad != B:
        xs = jnp.pad(xs, ((0, 0), (0, B_pad - B), (0, 0)))

    t_arr = jnp.asarray(t_indices, dtype=jnp.int32).reshape(N)

    grid_spec = pltpu.PrefetchScalarGridSpec(
        num_scalar_prefetch=1,  # t array lands in SMEM; visible to every index_map
        grid=(N,),
        in_specs=[
            pl.BlockSpec((None, B_pad, D_in),  lambda i, t: (i, 0, 0)),
            pl.BlockSpec((None, D_in, H_p),    lambda i, t: (t[i], 0, 0)),  # model[t_i] weights
            pl.BlockSpec((None, 1, H_p),       lambda i, t: (t[i], 0, 0)),
            pl.BlockSpec((None, H_p, D_out_p), lambda i, t: (t[i], 0, 0)),
            pl.BlockSpec((None, 1, D_out_p),   lambda i, t: (t[i], 0, 0)),
        ],
        out_specs=pl.BlockSpec((None, B_pad, D_out_p), lambda i, t: (i, 0, 0)),
    )

    out = pl.pallas_call(
        _mlp_kernel,
        out_shape=jax.ShapeDtypeStruct((N, B_pad, D_out_p), xs.dtype),
        grid_spec=grid_spec,
        compiler_params=pltpu.CompilerParams(
            dimension_semantics=("parallel",),  # independent dispatches -> 2 TCs on v7x
        ),
    )(t_arr, xs, w1, b1, w2, b2)

    return out[:, :B, :d_out]


def mlp_forward(t_idx, x, w1, b1, w2, b2, *, d_out=None):
    """Single dispatch: model[t_idx](x). x: (B, D_in) -> (B, d_out)."""
    t_arr = jnp.asarray(t_idx, dtype=jnp.int32).reshape(1)
    out = mlp_forward_batched(t_arr, x[None], w1, b1, w2, b2, d_out=d_out)
    return out[0]


class ModelFull:
    """JAX/Pallas port of the PyTorch ModelFull wrapper.

    `params` = (w1, b1, w2, b2), each stacked along a leading T axis
    (T == number of discretization steps, or 1 if not discretized).
    forward(tup) with tup = (t, x) reproduces:
        model[t](x)  if is_discretized
        model(x)     otherwise
    Weights are stored lane-padded (H, D_out -> multiples of 128) for lane-dense
    MXU compute and an unmasked output store; the logical output width is tracked
    in self.d_out and sliced in the wrapper.
    """

    def __init__(self, params, is_discretized=False, pasting_ret=False, orig_len=None,
                 d_out=None, _padded=False):
        w1, b1, w2, b2 = params
        if d_out is None:
            d_out = w2.shape[-1]
        self.d_out = int(d_out)
        if not _padded:
            w1, b1, w2, b2 = _pad_lane_dense(w1, b1, w2, b2)
        self.params = (w1, b1, w2, b2)
        self.is_discretized = is_discretized
        self.pasting_ret = pasting_ret
        if orig_len is None:
            self.orig_len = w1.shape[0] if is_discretized else 1
        else:
            self.orig_len = orig_len

    def forward(self, tup):
        t, x = tup
        t_idx = t if self.is_discretized else 0
        return mlp_forward(t_idx, x, *self.params, d_out=self.d_out)

    __call__ = forward

    def forward_batch(self, t_indices, xs):
        """Fused evaluation of many (t, x) dispatches in one pallas_call."""
        return mlp_forward_batched(t_indices, xs, *self.params, d_out=self.d_out)

    def get_pasting(self):
        if not self.pasting_ret:
            sliced = tuple(p[1:] for p in self.params)
            return ModelFull(sliced, self.is_discretized, True, self.orig_len,
                             d_out=self.d_out, _padded=True)
        return self

    def get_pasting_frac(self, size):
        sliced = tuple(p[-size:] for p in self.params)
        return ModelFull(sliced, self.is_discretized, True, self.orig_len,
                         d_out=self.d_out, _padded=True)


def make_params(key, T, D_in, H, D_out, dtype=jnp.float32):
    # TODO(synk): for large models on v6e/v7x store weights in bf16 (f32 accumulation is
    # already forced via preferred_element_type); kept f32 here for exact reference checks.
    k1, k2, k3, k4 = jax.random.split(key, 4)
    w1 = (jax.random.normal(k1, (T, D_in, H)) * 0.1).astype(dtype)
    b1 = (jax.random.normal(k2, (T, 1, H)) * 0.1).astype(dtype)
    w2 = (jax.random.normal(k3, (T, H, D_out)) * 0.1).astype(dtype)
    b2 = (jax.random.normal(k4, (T, 1, D_out)) * 0.1).astype(dtype)
    return w1, b1, w2, b2


def _ref_mlp(x, w1, b1, w2, b2):
    return jnp.maximum(x @ w1 + b1, 0.0) @ w2 + b2


if __name__ == "__main__":
    key = jax.random.PRNGKey(0)
    kx, kp, kxs, kt = jax.random.split(key, 4)

    B, D_in, H, D_out, T = 8, 32, 32, 4, 3
    x = jax.random.normal(kx, (B, D_in), jnp.float32)

    # Discretized case: a "list" of T sub-models, dispatched by scalar t.
    params = make_params(kp, T, D_in, H, D_out)
    model = ModelFull(params, is_discretized=True)

    t = 1
    out = jax.block_until_ready(model((t, x)))
    w1, b1, w2, b2 = params  # unpadded logical weights for the reference
    ref = _ref_mlp(x, w1[t], b1[t], w2[t], b2[t])
    assert out.shape == (B, D_out)
    assert jnp.allclose(out, ref, atol=1e-5, rtol=1e-5)

    # Batched dispatch: N (t, x) pairs fused into one pallas_call.
    N = 5
    xs = jax.random.normal(kxs, (N, B, D_in), jnp.float32)
    t_idxs = jax.random.randint(kt, (N,), 0, T, dtype=jnp.int32)
    outs = jax.block_until_ready(model.forward_batch(t_idxs, xs))
    refs = jnp.stack([_ref_mlp(xs[i], w1[int(t_idxs[i])], b1[int(t_idxs[i])],
                               w2[int(t_idxs[i])], b2[int(t_idxs[i])]) for i in range(N)])
    assert outs.shape == (N, B, D_out)
    assert jnp.allclose(outs, refs, atol=1e-5, rtol=1e-5)

    # Non-discretized case (single model, T=1 stack).
    params1 = make_params(kp, 1, D_in, H, D_out)
    model1 = ModelFull(params1, is_discretized=False)
    out1 = jax.block_until_ready(model1((0, x)))
    w1s, b1s, w2s, b2s = params1
    ref1 = _ref_mlp(x, w1s[0], b1s[0], w2s[0], b2s[0])
    assert jnp.allclose(out1, ref1, atol=1e-5, rtol=1e-5)

    # get_pasting()/get_pasting_frac() only re-slice the stacked weights (leading axis);
    # callers pass t re-based to the sliced stack, matching the PyTorch list-slice semantics.
    model_p = model.get_pasting()
    out_p = jax.block_until_ready(model_p((0, x)))  # sub-model 1 of the original stack
    assert jnp.allclose(out_p, _ref_mlp(x, w1[1], b1[1], w2[1], b2[1]), atol=1e-5, rtol=1e-5)

    model_f = model.get_pasting_frac(2)
    out_f = jax.block_until_ready(model_f((0, x)))  # sub-model T-2 of the original stack
    assert jnp.allclose(out_f, _ref_mlp(x, w1[T - 2], b1[T - 2], w2[T - 2], b2[T - 2]),
                        atol=1e-5, rtol=1e-5)

    print("KERNEL_OK")
</pallas_src>

<mosaic_0001>
module attributes {stable_mosaic.version = 11 : i64} {
  func.func @_mlp_kernel(%arg0: i32, %arg1: memref<1xi32, #tpu.memory_space<smem>>, %arg2: memref<1x8x32xf32, #tpu.memory_space<vmem>>, %arg3: memref<1x32x128xf32, #tpu.memory_space<vmem>>, %arg4: memref<1x1x128xf32, #tpu.memory_space<vmem>>, %arg5: memref<1x128x128xf32, #tpu.memory_space<vmem>>, %arg6: memref<1x1x128xf32, #tpu.memory_space<vmem>>, %arg7: memref<1x8x128xf32, #tpu.memory_space<vmem>>) attributes {dimension_semantics = [#tpu.dimension_semantics<parallel>], iteration_bounds = array<i64: 1>, scalar_prefetch = 1 : i64, scratch_operands = 0 : i64, tpu.core_type = #tpu.core_type<tc>, window_params = [{transform_indices = @transform_0, window_bounds = array<i64: 1, 8, 32>}, {transform_indices = @transform_1, window_bounds = array<i64: 1, 32, 128>}, {transform_indices = @transform_2, window_bounds = array<i64: 1, 1, 128>}, {transform_indices = @transform_3, window_bounds = array<i64: 1, 128, 128>}, {transform_indices = @transform_4, window_bounds = array<i64: 1, 1, 128>}, {transform_indices = @transform_5, window_bounds = array<i64: 1, 8, 128>}]} {
    %c0 = arith.constant 0 : index
    %c0_0 = arith.constant 0 : index
    %c0_1 = arith.constant 0 : index
    %0 = vector.load %arg2[%c0, %c0_0, %c0_1] : memref<1x8x32xf32, #tpu.memory_space<vmem>>, vector<1x8x32xf32>
    %1 = vector.shape_cast %0 : vector<1x8x32xf32> to vector<8x32xf32>
    %c0_2 = arith.constant 0 : index
    %c0_3 = arith.constant 0 : index
    %c0_4 = arith.constant 0 : index
    %2 = vector.load %arg3[%c0_2, %c0_3, %c0_4] : memref<1x32x128xf32, #tpu.memory_space<vmem>>, vector<1x32x128xf32>
    %3 = vector.shape_cast %2 : vector<1x32x128xf32> to vector<32x128xf32>
    %cst = arith.constant dense<0.000000e+00> : vector<8x128xf32>
    %4 = tpu.matmul %1, %3, %cst {dimension_numbers = #tpu.dot_dimension_numbers<[1], [0], [0], [1], [0, 0, 1, 1], [], []>} : vector<8x32xf32>, vector<32x128xf32>, vector<8x128xf32> -> vector<8x128xf32>
    %c0_5 = arith.constant 0 : index
    %c0_6 = arith.constant 0 : index
    %c0_7 = arith.constant 0 : index
    %5 = vector.load %arg4[%c0_5, %c0_6, %c0_7] : memref<1x1x128xf32, #tpu.memory_space<vmem>>, vector<1x1x128xf32>
    %6 = vector.shape_cast %5 : vector<1x1x128xf32> to vector<1x128xf32>
    %7 = vector.broadcast %6 : vector<1x128xf32> to vector<8x128xf32>
    %8 = arith.addf %4, %7 : vector<8x128xf32>
    %cst_8 = arith.constant 0.000000e+00 : f32
    %9 = vector.broadcast %cst_8 : f32 to vector<8x128xf32>
    %10 = arith.maximumf %8, %9 : vector<8x128xf32>
    %c0_9 = arith.constant 0 : index
    %c0_10 = arith.constant 0 : index
    %c0_11 = arith.constant 0 : index
    %11 = vector.load %arg5[%c0_9, %c0_10, %c0_11] : memref<1x128x128xf32, #tpu.memory_space<vmem>>, vector<1x128x128xf32>
    %12 = vector.shape_cast %11 : vector<1x128x128xf32> to vector<128x128xf32>
    %cst_12 = arith.constant dense<0.000000e+00> : vector<8x128xf32>
    %13 = tpu.matmul %10, %12, %cst_12 {dimension_numbers = #tpu.dot_dimension_numbers<[1], [0], [0], [1], [0, 0, 1, 1], [], []>} : vector<8x128xf32>, vector<128x128xf32>, vector<8x128xf32> -> vector<8x128xf32>
    %c0_13 = arith.constant 0 : index
    %c0_14 = arith.constant 0 : index
    %c0_15 = arith.constant 0 : index
    %14 = vector.load %arg6[%c0_13, %c0_14, %c0_15] : memref<1x1x128xf32, #tpu.memory_space<vmem>>, vector<1x1x128xf32>
    %15 = vector.shape_cast %14 : vector<1x1x128xf32> to vector<1x128xf32>
    %16 = vector.broadcast %15 : vector<1x128xf32> to vector<8x128xf32>
    %17 = arith.addf %13, %16 : vector<8x128xf32>
    %c0_16 = arith.constant 0 : index
    %c0_17 = arith.constant 0 : index
    %c0_18 = arith.constant 0 : index
    %18 = vector.load %arg7[%c0_16, %c0_17, %c0_18] : memref<1x8x128xf32, #tpu.memory_space<vmem>>, vector<1x8x128xf32>
    %19 = vector.shape_cast %18 : vector<1x8x128xf32> to vector<8x128xf32>
    %20 = vector.shape_cast %17 : vector<8x128xf32> to vector<1x8x128xf32>
    tpu.vector_store %arg7[%c0_16, %c0_17, %c0_18], %20 {strides = array<i32>} : memref<1x8x128xf32, #tpu.memory_space<vmem>>, vector<1x8x128xf32>,
    return
  }
  func.func @transform_0(%arg0: i32, %arg1: memref<1xi32, #tpu.memory_space<smem>>) -> (i32, i32, i32) {
    %c0_i32 = arith.constant 0 : i32
    %c0_i32_0 = arith.constant 0 : i32
    %c0_i32_1 = arith.constant 0 : i32
    return %arg0, %c0_i32, %c0_i32_0 : i32, i32, i32
  }
  func.func @transform_1(%arg0: i32, %arg1: memref<1xi32, #tpu.memory_space<smem>>) -> (i32, i32, i32) {
    %0 = arith.index_cast %arg0 : i32 to index
    %1 = memref.load %arg1[%0] : memref<1xi32, #tpu.memory_space<smem>>
    %c0_i32 = arith.constant 0 : i32
    %c0_i32_0 = arith.constant 0 : i32
    %c0_i32_1 = arith.constant 0 : i32
    return %1, %c0_i32, %c0_i32_0 : i32, i32, i32
  }
  func.func @transform_2(%arg0: i32, %arg1: memref<1xi32, #tpu.memory_space<smem>>) -> (i32, i32, i32) {
    %0 = arith.index_cast %arg0 : i32 to index
    %1 = memref.load %arg1[%0] : memref<1xi32, #tpu.memory_space<smem>>
    %c0_i32 = arith.constant 0 : i32
    %c0_i32_0 = arith.constant 0 : i32
    %c0_i32_1 = arith.constant 0 : i32
    return %1, %c0_i32, %c0_i32_0 : i32, i32, i32
  }
  func.func @transform_3(%arg0: i32, %arg1: memref<1xi32, #tpu.memory_space<smem>>) -> (i32, i32, i32) {
    %0 = arith.index_cast %arg0 : i32 to index
    %1 = memref.load %arg1[%0] : memref<1xi32, #tpu.memory_space<smem>>
    %c0_i32 = arith.constant 0 : i32
    %c0_i32_0 = arith.constant 0 : i32
    %c0_i32_1 = arith.constant 0 : i32
    return %1, %c0_i32, %c0_i32_0 : i32, i32, i32
  }
  func.func @transform_4(%arg0: i32, %arg1: memref<1xi32, #tpu.memory_space<smem>>) -> (i32, i32, i32) {
    %0 = arith.index_cast %arg0 : i32 to index
    %1 = memref.load %arg1[%0] : memref<1xi32, #tpu.memory_space<smem>>
    %c0_i32 = arith.constant 0 : i32
    %c0_i32_0 = arith.constant 0 : i32
    %c0_i32_1 = arith.constant 0 : i32
    return %1, %c0_i32, %c0_i32_0 : i32, i32, i32
  }
  func.func @transform_5(%arg0: i32, %arg1: memref<1xi32, #tpu.memory_space<smem>>) -> (i32, i32, i32) {
    %c0_i32 = arith.constant 0 : i32
    %c0_i32_0 = arith.constant 0 : i32
    %c0_i32_1 = arith.constant 0 : i32
    return %arg0, %c0_i32, %c0_i32_0 : i32, i32, i32
  }
}

</mosaic_0001>

<bundles_post_ra>
// kernel: tpu_custom_call.1
= control target key start
LH: loop header
LB: loop body
LE: loop exit
PB: predicated region body
PF: predicated region fallthrough
CT: control target
= control target key end

     0   :  { %12 = vsyncpa [#allocation5], 0  ;;  %s631_s0 = inlined_call_operand.<no memory space> [shape: s32[1], index: 0, kind: input, shape index: {}]   ;;  %s632_s1 = inlined_call_operand.hbm [shape: f32[1,8,32], index: 1, kind: input, shape index: {}]   ;;  %s633_s2 = inlined_call_operand.hbm [shape: f32[3,32,128], index: 2, kind: input, shape index: {}]   ;;  %s634_s3 = inlined_call_operand.vmem [shape: f32[3,1,128], index: 3, kind: input, shape index: {}]   ;;  %s635_s4 = inlined_call_operand.hbm [shape: f32[3,128,128], index: 4, kind: input, shape index: {}]   ;;  %s636_s5 = inlined_call_operand.vmem [shape: f32[3,1,128], index: 5, kind: input, shape index: {}]   ;;  %s637_s6 = inlined_call_operand.hbm [shape: f32[1,8,128], index: 6, kind: output, shape index: {}]  }
   0x1   :  { %13 = vsyncpa [#allocation8], 0  ;;  %s314_s23 = sshll.u32 %s631_s0, 9 }
   0x2   :  { %14 = vsyncpa [#allocation6], 0  ;;  %s33_s26 = scalar_lea.hbm %s633_s2, %s314_s23  ;;  %s521_s27 = smov [#allocation7]  }
   0x3   :  { %s34_s28 = sshll.u32 %s521_s27, 4  ;;  %s423_s29 = scalar_lea.hbm %s33_s26, 512  ;;  %s35_s28 = int_to_ptr.vmem [resolvable:$true] %s34_s28 }
   0x4   :  { %p424_p0 = scmp.ne.s32.totalorder %s33_s26, %s423_s29  ;;  %s425_s8 = scalar_lea.hbm %s633_s2, 1536 }
   0x5   :  { %p426_p1 = scmp.lt.u32.totalorder %s33_s26, %s633_s2  ;;  %p427_p2 = scmp.lt.u32.totalorder %s425_s8, %s423_s29 }
   0x6   :  { %p429_p4 = scmp.lt.u32.totalorder %s423_s29, %s33_s26 }
   0x7   :  { %p428_p3 = por %p427_p2, %p426_p1 }
   0x9   :  { %p430_p5 = por %p429_p4, %p428_p3 }
   0xb   :  { %p431_p6 = pnand %p430_p5, %p424_p0 }
   0xd   :  { %434 = shalt.err (!%p431_p6)
}
   0xe   :  { %s435_s11 = scalar_lea.vmem %s35_s28, 512  ;;  %p440_p8 = scmp.lt.s32.totalorder %s35_s28, %s35_s28 }
   0xf   :  { %p436_p7 = scmp.ne.s32.totalorder %s35_s28, %s435_s11  ;;  %p441_p9 = scmp.lt.s32.totalorder %s435_s11, %s435_s11 }
  0x11   :  { %p442_p10 = por %p441_p9, %p440_p8 }
  0x13   :  { %p443_p11 = pnand %p442_p10, %p436_p7 }
  0x15   :  { %446 = shalt.err (!%p443_p11)
}
  0x16   :  { %s522_s12 = smov 128   ;;  %s523_s13 = smov 8  }
  0x17   :  { %40 = dma.hbm_to_vmem [thread:$0]  %s33_s26, 512, %s35_s28, [#allocation8], %s522_s12, %s522_s12, %s523_s13  }
  0x18   :  { %s524_s2 = smov [#allocation4]   ;;  %s315_s17 = sshll.u32 %s631_s0, 11 }
  0x19   :  { %s21_s14 = sshll.u32 %s524_s2, 4  ;;  %s447_s20 = scalar_lea.hbm %s632_s1, 128  ;;  %s22_s14 = int_to_ptr.vmem [resolvable:$true] %s21_s14 }
  0x1a   :  { %p448_p12 = scmp.ne.s32.totalorder %s632_s1, %s447_s20  ;;  %p451_p13 = scmp.lt.u32.totalorder %s447_s20, %s632_s1 }
  0x1c   :  { %p453_p0 = pnand %p451_p13, %p448_p12 }
  0x1e   :  { %456 = shalt.err (!%p453_p0)
}
  0x1f   :  { %s457_s25 = scalar_lea.vmem %s22_s14, 128  ;;  %p462_p2 = scmp.lt.s32.totalorder %s22_s14, %s22_s14 }
  0x20   :  { %p458_p1 = scmp.ne.s32.totalorder %s22_s14, %s457_s25  ;;  %p463_p3 = scmp.lt.s32.totalorder %s457_s25, %s457_s25 }
  0x22   :  { %p464_p4 = por %p463_p3, %p462_p2 }
  0x24   :  { %p465_p5 = pnand %p464_p4, %p458_p1 }
  0x26   :  { %468 = shalt.err (!%p465_p5)
}
  0x27   :  { %24 = dma.hbm_to_vmem [thread:$0]  %s632_s1, 128, %s22_s14, [#allocation5]  }
  0x28   :  { %s56_s30 = scalar_lea.hbm %s635_s4, %s315_s17  ;;  %s525_s7 = smov [#allocation9]  }
  0x29   :  { %s57_s8 = sshll.u32 %s525_s7, 4  ;;  %s469_s9 = scalar_lea.hbm %s56_s30, 2048  ;;  %s58_s8 = int_to_ptr.vmem [resolvable:$true] %s57_s8 }
  0x2a   :  { %p470_p6 = scmp.ne.s32.totalorder %s56_s30, %s469_s9  ;;  %s471_s2 = scalar_lea.hbm %s635_s4, 6144 }
  0x2b   :  { %p472_p7 = scmp.lt.u32.totalorder %s56_s30, %s635_s4  ;;  %p473_p8 = scmp.lt.u32.totalorder %s471_s2, %s469_s9 }
  0x2c   :  { %p475_p10 = scmp.lt.u32.totalorder %s469_s9, %s56_s30 }
  0x2d   :  { %p474_p9 = por %p473_p8, %p472_p7 }
  0x2f   :  { %p476_p11 = por %p475_p10, %p474_p9 }
  0x31   :  { %p477_p12 = pnand %p476_p11, %p470_p6 }
  0x33   :  { %480 = shalt.err (!%p477_p12)
}
  0x34   :  { %s481_s1 = scalar_lea.vmem %s58_s8, 2048  ;;  %p486_p0 = scmp.lt.s32.totalorder %s58_s8, %s58_s8 }
  0x35   :  { %p482_p13 = scmp.ne.s32.totalorder %s58_s8, %s481_s1  ;;  %p487_p1 = scmp.lt.s32.totalorder %s481_s1, %s481_s1 }
  0x37   :  { %p488_p2 = por %p487_p1, %p486_p0 }
  0x39   :  { %p489_p3 = pnand %p488_p2, %p482_p13 }
  0x3b   :  { %492 = shalt.err (!%p489_p3)
}
  0x3c   :  { %63 = dma.hbm_to_vmem [thread:$0]  %s56_s30, 2048, %s58_s8, [#allocation8], %s522_s12, %s522_s12, %s523_s13  }
  0x3d   :  { %515 = dma.done.wait [#allocation5], 128  }
  0x3e   :  { %516 = vsyncadd [#allocation5], 4294967168 }
  0x3f   :  { %517 = dma.done.wait [#allocation8], 2560  }
  0x40   :  { %518 = vsyncadd [#allocation8], 4294964736  ;;  %v526_v0 = vmov 0.0|0.0   ;;  %vm527_vm0 = vmmov 0   ;;  %v528_v1 = vmov 0.0   ;;  %v101_v2 = vld [vmem:[#allocation7] sm:$0xff] }
  0x41   :  { %384 = vmatprep.subr.bf16.mxu0 %v526_v0  ;;  %346 = vmatprep.mubr.msk.f32.mxu0 %vm527_vm0, %v528_v1  ;;  %v102_v3 = vld [vmem:[#allocation7 + $0x8] sm:$0xff]  ;;  %v103_v4 = vld [vmem:[#allocation7 + $0x10] sm:$0xff]  ;;  %v104_v6 = vld [vmem:[#allocation7 + $0x18] sm:$0xff]  ;;  %vm112_vm1 = vcmask 261120   ;;  %p90_p4 = scmp.lt.s32.totalorder %s631_s0, 2  ;;  %s529_s23 = smov [#allocation10]  }
  0x42   :  { %390 = vmatprep.subr.bf16.mxu1 %v526_v0  ;;  %381 = vmatprep.mubr.msk.f32.mxu1 %vm527_vm0, %v528_v1  ;;  %v385_v5 = vpack.c.bf16 %v102_v3, %v101_v2  ;;  %v187_v7 = vld [vmem:[#allocation9] sm:$0xff]  ;;  %v188_v8 = vld [vmem:[#allocation9 + $0x8] sm:$0xff]  ;;  %v189_v9 = vld [vmem:[#allocation9 + $0x10] sm:$0xff]  ;;  %v388_v11 = vpack.c.bf16 %v104_v6, %v103_v4  ;;  %s287_s24 = sshll.u32 %s529_s23, 4  ;;  %s288_s24 = int_to_ptr.vmem [resolvable:$true] %s287_s24 }
  0x43   :  { %v190_v10 = vld [vmem:[#allocation9 + $0x18] sm:$0xff]  ;;  %v391_v12 = vpack.c.bf16 %v188_v8, %v187_v7  ;;  %v191_v14 = vld [vmem:[#allocation9 + $0x20] sm:$0xff]  ;;  %v192_v15 = vld [vmem:[#allocation9 + $0x28] sm:$0xff]  ;;  %s639_s0 = smov (!%p90_p4, %s631_s0), 2  ;;  %s493_s25 = scalar_lea.vmem %s288_s24, 128 }
  0x44   :  { %386 = vmatpush3.bf16.msra.mxu0 %v385_v5  ;;  %v394_v13 = vpack.c.bf16 %v190_v10, %v189_v9  ;;  %v100_v16 = vld [vmem:[#allocation4] sm:$0xff]  ;;  %v397_v17 = vpack.c.bf16 %v192_v15, %v191_v14  ;;  %v193_v18 = vld [vmem:[#allocation9 + $0x30] sm:$0xff]  ;;  %v195_v21 = vld [vmem:[#allocation9 + $0x40] sm:$0xff]  ;;  %s92_s19 = scalar_lea.vmem %s634_s3, %s639_s0  ;;  %s98_s22 = scalar_lea.vmem %s636_s5, %s639_s0 }
  0x45   :  { %387 = vmatprep.subr.bf16.mxu0 %v526_v0  ;;  %392 = vmatpush3.bf16.msra.mxu1 %v391_v12  ;;  %v194_v19 = vld [vmem:[#allocation9 + $0x38] sm:$0xff]  ;;  %v196_v22 = vld [vmem:[#allocation9 + $0x48] sm:$0xff]  ;;  %v197_v24 = vld [vmem:[#allocation9 + $0x50] sm:$0xff]  ;;  %p494_p5 = scmp.ne.s32.totalorder %s288_s24, %s493_s25  ;;  %p498_p6 = scmp.lt.s32.totalorder %s288_s24, %s288_s24 }
  0x46   :  { %393 = vmatprep.subr.bf16.mxu1 %v526_v0  ;;  %v400_v20 = vpack.c.bf16 %v194_v19, %v193_v18  ;;  %v403_v23 = vpack.c.bf16 %v196_v22, %v195_v21  ;;  %v198_v25 = vld [vmem:[#allocation9 + $0x58] sm:$0xff]  ;;  %v199_v27 = vld [vmem:[#allocation9 + $0x60] sm:$0xff]  ;;  %v200_v28 = vld [vmem:[#allocation9 + $0x68] sm:$0xff]  ;;  %p499_p7 = scmp.lt.s32.totalorder %s493_s25, %s493_s25 }
  0x47   :  { %v406_v26 = vpack.c.bf16 %v198_v25, %v197_v24  ;;  %v409_v29 = vpack.c.bf16 %v200_v28, %v199_v27  ;;  %v201_v30 = vld [vmem:[#allocation9 + $0x70] sm:$0xff]  ;;  %v202_v31 = vld [vmem:[#allocation9 + $0x78] sm:$0xff] }
  0x48   :  { %389 = vmatpush3.bf16.msra.mxu0 %v388_v11  ;;  %v412_v32 = vpack.c.bf16 %v202_v31, %v201_v30  ;;  %v311_v33 = vld [vmem:[%s92_s19] ss:$0 sm:$0xff]  ;;  %p500_p8 = por %p499_p7, %p498_p6 }
  0x49   :  { %395 = vmatpush3.bf16.msra.mxu1 %v394_v13  ;;  %v313_v38 = vld [vmem:[%s98_s22] ss:$0 sm:$0xff] }
  0x4a   :  { %396 = vmatprep.subr.bf16.mxu1 %v526_v0  ;;  %p501_p9 = pnand %p500_p8, %p494_p5 }
  0x4b   :  { %347 = vmatmul.mubr.msk.f32.vlgmr.msra.gmra.mrb[0].mxu0 %vm112_vm1, %v100_v16 }
  0x4d   :  { %398 = vmatpush3.bf16.msra.mxu1 %v397_v17 }
  0x4e   :  { %399 = vmatprep.subr.bf16.mxu1 %v526_v0 }
  0x51   :  { %401 = vmatpush3.bf16.msra.mxu1 %v400_v20 }
  0x52   :  { %402 = vmatprep.subr.bf16.mxu1 %v526_v0 }
  0x55   :  { %404 = vmatpush3.bf16.msra.mxu1 %v403_v23 }
  0x56   :  { %405 = vmatprep.subr.bf16.mxu1 %v526_v0 }
  0x59   :  { %407 = vmatpush3.bf16.msra.mxu1 %v406_v26 }
  0x5a   :  { %408 = vmatprep.subr.bf16.mxu1 %v526_v0 }
  0x5d   :  { %410 = vmatpush3.bf16.msra.mxu1 %v409_v29 }
  0x5e   :  { %411 = vmatprep.subr.bf16.mxu1 %v526_v0 }
  0x61   :  { %413 = vmatpush3.bf16.msra.mxu1 %v412_v32 }
 0x11e   :  { %v182_v34 = vpop.f32.mrb[0].mxu0 }
 0x11f   :  { %v183_v35 = vadd.f32 %v311_v33, %v182_v34  ;;  %v348_v36 = vpop.f32.mrb[1].mxu0 }
 0x121   :  { %v186_v37 = vmax.f32 %v183_v35, 0.0 }
 0x123   :  { %382 = vmatmul.mubr.f32.vlgmr.msra.gmra.mrb[0].mxu1 %v186_v37 }
 0x1f6   :  { %v276_v39 = vpop.f32.mrb[0].mxu1 }
 0x1f7   :  { %v277_v40 = vadd.f32 %v313_v38, %v276_v39  ;;  %v383_v41 = vpop.f32.mrb[1].mxu1 }
 0x1f9   :  { %280 = vst [vmem:[#allocation10] sm:$0xff] %v277_v40 }
 0x1fa   :  { %504 = shalt.err (!%p501_p9)
}
 0x1fb   :  { %s505_s27 = scalar_lea.hbm %s637_s6, 128 }
 0x1fc   :  { %p506_p10 = scmp.ne.s32.totalorder %s637_s6, %s505_s27  ;;  %p509_p11 = scmp.lt.u32.totalorder %s505_s27, %s637_s6 }
 0x1fe   :  { %p511_p12 = pnand %p509_p11, %p506_p10 }
 0x200   :  { %514 = shalt.err (!%p511_p12)
}
 0x201   :  { %290 = dma.vmem_to_hbm [thread:$0]  %s288_s24, 128, %s637_s6, [#allocation6]  }
 0x202   :  { %519 = dma.done.wait [#allocation6], 128  }
 0x203   :  { %520 = vsyncadd [#allocation6], 4294967168 }
 0x204   :  { %294 = vsyncpa [#allocation5], 1 }
 0x205   :  { %295 = vsyncpa [#allocation8], 1 }
 0x206   :  { %296 = vsyncpa [#allocation6], 1 }

</bundles_post_ra>
